<compile_context>
chip_gen: v5e
topology: v5e:2x2
jax: 0.10.0
libtpu: 0.0.40
codegen_flags: <defaults>
</compile_context>

<pallas_src>
import functools
import math

import jax
import jax.numpy as jnp
from jax.experimental import pallas as pl
from jax.experimental.pallas import tpu as pltpu


def _pe_scale_add_kernel(x_ref, p_ref, o_ref, *, scale):
    # x_ref/o_ref: (Ts, H2) tile with the batch dim squeezed away.
    # p_ref: matching (Ts, H2) fp32 slice of the positional table.
    x = x_ref[...].astype(jnp.float32)
    if scale != 1.0:          # static Python float -> folded at trace time
        x = x * scale
    o_ref[...] = (x + p_ref[...]).astype(o_ref.dtype)


def make_positional_table(num_hiddens: int, max_steps: int = 1000) -> jnp.ndarray:
    """P[max_steps, num_hiddens], matching the PyTorch __init__ (odd H guarded)."""
    i = jnp.arange(max_steps, dtype=jnp.float32).reshape(-1, 1)
    j = jnp.arange(0, num_hiddens, 2, dtype=jnp.float32).reshape(1, -1)
    X = i / jnp.power(10000.0, j / num_hiddens)
    P = jnp.zeros((max_steps, num_hiddens), dtype=jnp.float32)
    P = P.at[:, 0::2].set(jnp.sin(X))
    P = P.at[:, 1::2].set(jnp.cos(X[:, : num_hiddens // 2]))
    return P


def _sublane_granularity(dtype) -> int:
    """Rows per packed sublane tile: 8 for 32-bit, 16 for 16-bit, 32 for 8-bit."""
    return {4: 8, 2: 16, 1: 32}.get(jnp.dtype(dtype).itemsize, 8)


def _round_up(n: int, m: int) -> int:
    return -(-n // m) * m


def positional_encoding(x: jnp.ndarray, P: jnp.ndarray, *, scale: float = 1.0,
                        out_dtype=None) -> jnp.ndarray:
    """
    x: [batch, num_steps, num_hiddens]
    P: [max_steps, num_hiddens] precomputed fp32 sinusoidal table
    scale: static scalar fused into the kernel (use sqrt(num_hiddens) to fuse the
           Encoder/Decoder embedding scale); 1.0 reproduces PositionalEncoding.
    out_dtype: output dtype override (e.g. jnp.bfloat16 to halve writeback bytes);
               default follows PyTorch promotion (x + fp32 P).
    returns scale * x + P[:num_steps][None]  (dropout in eval mode = identity)
    """
    B, S, H = x.shape
    assert S <= P.shape[0], f"num_steps={S} exceeds max_steps={P.shape[0]}"
    assert H == P.shape[1], "hidden size mismatch between x and P"

    if out_dtype is None:
        # PyTorch promotion semantics: X + fp32 P promotes to at least fp32.
        out_dtype = jnp.promote_types(x.dtype, P.dtype)

    itemsize = max(jnp.dtype(x.dtype).itemsize, jnp.dtype(out_dtype).itemsize, 4)
    g = max(_sublane_granularity(x.dtype), _sublane_granularity(out_dtype), 8)
    budget_bytes = 4 * 1024 * 1024  # per-tile target; ~6x double-buffered < 48 MiB

    # Lane-dense layout: fold r sequence rows into the minor dim so stores use
    # full 128-lane vregs (H2 = lcm(H, 128) is always a multiple of 128).
    r = 128 // math.gcd(H, 128)
    if r > 1 and H * r * g * itemsize > budget_bytes:
        r = 1  # pathological H: folding would make a single row-group too large
    H2 = H * r
    S2 = _round_up(S, r) // r  # folded row count (sequence padded up to r)

    # Row-tile choice: largest multiple-of-g divisor of S2 within budget; if S2
    # is small use the full extent; otherwise pad S2 to a multiple of the tile.
    max_rows = max(g, (budget_bytes // (H2 * itemsize)) // g * g)
    if S2 <= max_rows:
        Ts = S2  # full-extent block is always legal
    else:
        Ts = None
        d = g
        while d <= max_rows:
            if S2 % d == 0:
                Ts = d
            d += g
        if Ts is None:
            Ts = max_rows  # no clean divisor: pad S2 up to a multiple of Ts
    S2p = _round_up(S2, Ts)
    n_s = S2p // Ts
    S_pad = S2p * r  # total padded sequence length

    # Wrapper-side padding + lane-dense reshape (padded rows are sliced off).
    x_p = x if S_pad == S else jnp.pad(x, ((0, 0), (0, S_pad - S), (0, 0)))
    p = P[:S].astype(jnp.float32)
    if S_pad != S:
        p = jnp.pad(p, ((0, S_pad - S), (0, 0)))
    x2 = x_p.reshape(B, S2p, H2)
    p2 = p.reshape(S2p, H2)

    kernel = functools.partial(_pe_scale_add_kernel, scale=float(scale))

    # Grid: sequence chunks outer, batch inner. Both axes are "parallel" (no
    # accumulator), so the megacore split works even when n_s == 1; P's block
    # index is constant across consecutive batch steps, so its DMA is deduped.
    out2 = pl.pallas_call(
        kernel,
        out_shape=jax.ShapeDtypeStruct((B, S2p, H2), out_dtype),
        grid_spec=pltpu.PrefetchScalarGridSpec(
            num_scalar_prefetch=0,
            grid=(n_s, B),
            in_specs=[
                # batch dim squeezed (None) -> kernel sees 2-D (Ts, H2) tiles
                pl.BlockSpec((None, Ts, H2), lambda s, b: (b, s, 0)),
                pl.BlockSpec((Ts, H2), lambda s, b: (s, 0)),
            ],
            out_specs=pl.BlockSpec((None, Ts, H2), lambda s, b: (b, s, 0)),
        ),
        compiler_params=pltpu.CompilerParams(
            dimension_semantics=("parallel", "parallel"),
            vmem_limit_bytes=48 * 1024 * 1024,
        ),
    )(x2, p2)

    out = out2.reshape(B, S_pad, H)
    if S_pad != S:
        out = out[:, :S, :]
    return out


if __name__ == "__main__":
    max_steps = 1000
    key = jax.random.PRNGKey(0)

    # --- 1) plain PositionalEncoding, spec-sized (fold 32 -> 128 lanes) ---
    B, S, H = 2, 8, 32
    x = jax.random.normal(jax.random.fold_in(key, 0), (B, S, H), dtype=jnp.float32)
    P = make_positional_table(H, max_steps)
    out = jax.block_until_ready(positional_encoding(x, P))
    ref = x + P[:S, :][None, :, :]
    assert out.shape == (B, S, H) and out.dtype == ref.dtype
    assert jnp.allclose(out, ref, atol=1e-6)

    # --- 2) fused embedding scale (Encoder/Decoder stem: X*sqrt(H) + P) ---
    B, S, H = 2, 128, 32
    x = jax.random.normal(jax.random.fold_in(key, 1), (B, S, H), dtype=jnp.float32)
    P = make_positional_table(H, max_steps)
    out = jax.block_until_ready(positional_encoding(x, P, scale=math.sqrt(H)))
    ref = x * math.sqrt(H) + P[:S, :][None, :, :]
    assert jnp.allclose(out, ref, atol=1e-5, rtol=1e-6)

    # --- 3) odd sequence length -> padded, still lane-dense output ---
    B, S, H = 2, 7, 32
    x = jax.random.normal(jax.random.fold_in(key, 2), (B, S, H), dtype=jnp.float32)
    P = make_positional_table(H, max_steps)
    out = jax.block_until_ready(positional_encoding(x, P))
    ref = x + P[:S, :][None, :, :]
    assert out.shape == (B, S, H)
    assert jnp.allclose(out, ref, atol=1e-6)

    # --- 4) bf16 activation with narrow (bf16) store path ---
    B, S, H = 2, 9, 48
    x = jax.random.normal(jax.random.fold_in(key, 3), (B, S, H)).astype(jnp.bfloat16)
    P = make_positional_table(H, max_steps)
    out = jax.block_until_ready(
        positional_encoding(x, P, out_dtype=jnp.bfloat16))
    ref = (x.astype(jnp.float32) + P[:S, :][None, :, :]).astype(jnp.bfloat16)
    assert out.shape == (B, S, H) and out.dtype == jnp.bfloat16
    assert jnp.allclose(out.astype(jnp.float32), ref.astype(jnp.float32), atol=1e-2)

    print("KERNEL_OK")
</pallas_src>

<mosaic_0001>
module attributes {stable_mosaic.version = 11 : i64} {
  func.func @_pe_scale_add_kernel(%arg0: i32, %arg1: i32, %arg2: memref<1x2x128xf32, #tpu.memory_space<vmem>>, %arg3: memref<2x128xf32, #tpu.memory_space<vmem>>, %arg4: memref<1x2x128xf32, #tpu.memory_space<vmem>>) attributes {dimension_semantics = [#tpu.dimension_semantics<parallel>, #tpu.dimension_semantics<parallel>], iteration_bounds = array<i64: 1, 2>, scalar_prefetch = 0 : i64, scratch_operands = 0 : i64, tpu.core_type = #tpu.core_type<tc>, window_params = [{transform_indices = @transform_0, window_bounds = array<i64: 1, 2, 128>}, {transform_indices = @transform_1, window_bounds = array<i64: 2, 128>}, {transform_indices = @transform_2, window_bounds = array<i64: 1, 2, 128>}]} {
    %c0 = arith.constant 0 : index
    %c0_0 = arith.constant 0 : index
    %c0_1 = arith.constant 0 : index
    %0 = vector.load %arg2[%c0, %c0_0, %c0_1] : memref<1x2x128xf32, #tpu.memory_space<vmem>>, vector<1x2x128xf32>
    %1 = vector.shape_cast %0 : vector<1x2x128xf32> to vector<2x128xf32>
    %c0_2 = arith.constant 0 : index
    %c0_3 = arith.constant 0 : index
    %2 = vector.load %arg3[%c0_2, %c0_3] : memref<2x128xf32, #tpu.memory_space<vmem>>, vector<2x128xf32>
    %3 = arith.addf %1, %2 : vector<2x128xf32>
    %c0_4 = arith.constant 0 : index
    %c0_5 = arith.constant 0 : index
    %c0_6 = arith.constant 0 : index
    %4 = vector.load %arg4[%c0_4, %c0_5, %c0_6] : memref<1x2x128xf32, #tpu.memory_space<vmem>>, vector<1x2x128xf32>
    %5 = vector.shape_cast %4 : vector<1x2x128xf32> to vector<2x128xf32>
    %6 = vector.shape_cast %3 : vector<2x128xf32> to vector<1x2x128xf32>
    tpu.vector_store %arg4[%c0_4, %c0_5, %c0_6], %6 {strides = array<i32>} : memref<1x2x128xf32, #tpu.memory_space<vmem>>, vector<1x2x128xf32>,
    return
  }
  func.func @transform_0(%arg0: i32, %arg1: i32) -> (i32, i32, i32) {
    %c0_i32 = arith.constant 0 : i32
    %c0_i32_0 = arith.constant 0 : i32
    return %arg1, %arg0, %c0_i32 : i32, i32, i32
  }
  func.func @transform_1(%arg0: i32, %arg1: i32) -> (i32, i32) {
    %c0_i32 = arith.constant 0 : i32
    %c0_i32_0 = arith.constant 0 : i32
    return %arg0, %c0_i32 : i32, i32
  }
  func.func @transform_2(%arg0: i32, %arg1: i32) -> (i32, i32, i32) {
    %c0_i32 = arith.constant 0 : i32
    %c0_i32_0 = arith.constant 0 : i32
    return %arg1, %arg0, %c0_i32 : i32, i32, i32
  }
}

</mosaic_0001>

<bundles_post_ra>
// kernel: tpu_custom_call.1
= control target key start
LH: loop header
LB: loop body
LE: loop exit
PB: predicated region body
PF: predicated region fallthrough
CT: control target
= control target key end

     0   :  { %7 = vsyncpa [#allocation3], 0  ;;  %s714_s0 = inlined_call_operand.hbm [shape: f32[2,2,128], index: 0, kind: input, shape index: {}]   ;;  %s715_s1 = inlined_call_operand.hbm [shape: f32[2,128], index: 1, kind: input, shape index: {}]   ;;  %s716_s2 = inlined_call_operand.hbm [shape: f32[2,2,128], index: 2, kind: output, shape index: {}]  }
   0x1   :  { %9 = vsyncpa [#allocation3 + $0x1], 0 }
   0x2   :  { %10 = vsyncpa [#allocation6], 0 }
   0x3   :  { %11 = vsyncpa [#allocation4], 0 }
   0x4   :  { %13 = vsyncpa [#allocation4 + $0x1], 0  ;;  %s565_s9 = smov 0   ;;  %s567_s10 = smov 0  }
   0x5   :  { %s569_s11 = smov 0   ;;  %s571_s12 = smov 0  }
   0x6   :  { %s573_s13 = smov 0   ;;  %s575_s14 = smov 0  }
   0x7 LB: > { %s313_s15 = sadd.s32 4294967295, %s547_s14   ;;  %s314_s16 = sadd.s32 4294967294, %s547_s14   ;;  %s547_s14 = sphi %s575_s14, %s19_s14   ;;  %s543_s13 = sphi %s573_s13, %s728_s13   ;;  %s539_s12 = sphi %s571_s12, %s727_s12   ;;  %s535_s11 = sphi %s569_s11, %s726_s11   ;;  %s531_s10 = sphi %s567_s10, %s725_s10   ;;  %s527_s9 = sphi %s565_s9, %s724_s9  }
   0x8   : > { %p53_p0 = scmp.ne.s32.totalorder %s531_s10, %s527_s9  ;;  %p599_p1 = scmp.eq.s32.totalorder %s313_s15, 0 }
   0x9   : > { %p603_p2 = scmp.eq.s32.totalorder %s313_s15, 1  ;;  %p111_p3 = scmp.eq.s32.totalorder %s314_s16, 1 }
   0xa   : > { %p609_p4 = por %p599_p1, %p53_p0  ;;  %p315_p5 = scmp.ge.s32.totalorder %s547_s14, 1 }
   0xb   : > { %p614_p6 = por %p111_p3, %p53_p0  ;;  %p118_p7 = scmp.lt.s32.totalorder %s547_s14, 3 }
   0xc   : > { %s132_s23 = sshll.u32 %s715_s1, 4  ;;  %p317_p9 = scmp.ge.s32.totalorder %s547_s14, 2  ;;  %s133_s23 = int_to_ptr.hbm [resolvable:$true] %s132_s23 }
   0xd   : > { %p622_p8 = pnand %p315_p5, %p118_p7  ;;  %s549_s25 = smov [#allocation5]  }
   0xe   : > { %s134_s26 = sshll.u32 %s549_s25, 4  ;;  %s28_s27 = sadd.s32 1, %s543_s13  ;;  %s135_s26 = int_to_ptr.vmem [resolvable:$true] %s134_s26 }
   0xf   : > { %p336_p10 = pneg %p622_p8  ;;  %p29_p12 = scmp.ge.s32.totalorder %s28_s27, 2 }
  0x10   : > { %s40_s28 = sadd.s32 1, %s535_s11  ;;  %p47_p13 = scmp.ne.s32.totalorder %s535_s11, %s531_s10 }
  0x11   : > { %p337_p11 = pnand %p336_p10, %p599_p1  ;;  %p48_p0 = scmp.eq.s32.totalorder %s547_s14, 0 }
  0x12   : > { %s730_s27 = smov (%p29_p12, %s28_s27), 0  ;;  %p644_p5 = por %p603_p2, %p47_p13 }
  0x13   : > { %339 = dma.hbm_to_vmem [thread:$0]  (!%p337_p11), %s133_s23, 32, %s135_s26, [#allocation6]  }
  0x14   : > { %p638_p3 = por %p48_p0, %p47_p13  ;;  %s35_s3 = ssub.s32 %s543_s13, %s730_s27 }
  0x15   : > { %p349_p7 = scmp.lt.s32.totalorder %s547_s14, 2  ;;  %p38_p10 = scmp.eq.s32.totalorder %s35_s3, 0 }
  0x16   : > { %s145_s4 = sand.u32 1, %s535_s11   ;;  %s319_s7 = sshll.u32 %s543_s13, 1 }
  0x17   : > { %s318_s5 = sshll.u32 %s145_s4, 1  ;;  %s154_s16 = scalar_lea.hbm %s714_s0, %s319_s7 }
  0x18   : > { %s653_s6 = scalar_select %p38_p10, %s535_s11, %s40_s28  }
  0x19   : > { %s149_s21 = scalar_lea.vmem [#allocation2], %s318_s5  ;;  %s156_s18 = sshll.u32 %s154_s16, 4  ;;  %s157_s18 = int_to_ptr.hbm [resolvable:$true] %s156_s18 }
  0x1a   : > { %s158_s22 = sshll.u32 %s149_s21, 4  ;;  %p341_p2 = pnand %p349_p7, %p638_p3  ;;  %s159_s22 = int_to_ptr.vmem [resolvable:$true] %s158_s22 }
  0x1b   : > { %s146_s23 = scalar_lea.sflag [#allocation3], %s145_s4  ;;  %167 = sbr.rel (%p622_p8) target bundleno = 50 (0x32), region = 28 }
  0x1c   : > { %343 = dma.hbm_to_vmem [thread:$0]  (!%p341_p2), %s157_s18, 32, %s159_s22, %s146_s23  }
  0x1d   : > { %s664_s25 = sand.u32 (!%p622_p8), 1, %s531_s10  }
  0x1e   : > { %s321_s26 = sshll.u32 (!%p622_p8), %s664_s25, 1  ;;  %s170_s28 = scalar_lea.sflag (!%p622_p8), [#allocation3], %s664_s25 }
  0x1f   : > { %s173_s3 = scalar_lea.vmem (!%p622_p8), [#allocation2], %s321_s26 }
  0x20   : > { %514 = dma.done.wait (%p609_p4), %s170_s28, 32  }
  0x21   : > { %516 = vsyncadd (%p609_p4), %s170_s28, 4294967264 }
  0x22   : > { %518 = dma.done.wait (%p599_p1), [#allocation6], 32  }
  0x23   : > { %520 = vsyncadd (%p599_p1), [#allocation6], 4294967264  ;;  %s325_s24 = sshll.u32 %s539_s12, 1  ;;  %s199_s7 = scalar_lea.vmem [#allocation7], %s321_s26  ;;  %v200_v0 = vld [vmem:[%s173_s3] sm:$0x3] }
  0x24   : > { %s216_s5 = scalar_lea.hbm %s716_s2, %s325_s24  ;;  %s218_s8 = sshll.u32 %s199_s7, 4  ;;  %v201_v1 = vld [vmem:[#allocation5] sm:$0x3]  ;;  %s219_s8 = int_to_ptr.vmem [resolvable:$true] %s218_s8 }
  0x25   : > { %s220_s15 = sshll.u32 %s216_s5, 4  ;;  %v202_v2 = vadd.f32 %v201_v1, %v200_v0  ;;  %s205_s19 = scalar_lea.sflag [#allocation4], %s664_s25  ;;  %s221_s15 = int_to_ptr.hbm [resolvable:$true] %s220_s15 }
  0x26   : > { %s475_s17 = sshra.s32 %s221_s15, 4  ;;  %s481_s22 = scalar_lea.hbm %s716_s2, 4  ;;  %s476_s17 = int_to_ptr.hbm [resolvable:$true] %s475_s17 }
  0x27   : > { %203 = vst [vmem:[%s199_s7] sm:$0x3] %v202_v2  ;;  %s477_s16 = scalar_lea.hbm %s476_s17, 2  ;;  %p482_p11 = scmp.lt.s32.totalorder %s476_s17, %s716_s2 }
  0x28   : > { %p478_p1 = scmp.ne.s32.totalorder %s476_s17, %s477_s16  ;;  %p483_p12 = scmp.lt.s32.totalorder %s481_s22, %s477_s16 }
  0x2a   : > { %p479_p4 = pnand %p478_p1, %p644_p5  ;;  %p484_p13 = por %p483_p12, %p482_p11 }
  0x2c   : > { %p480_p8 = pneg %p479_p4 }
  0x2e   : > { %p485_p0 = pnand %p484_p13, %p480_p8 }
  0x30   : > { %488 = shalt.err (!%p485_p0)
}
  0x31   : > { %334 = dma.vmem_to_hbm [thread:$0]  (%p644_p5), %s219_s8, 32, %s221_s15, %s205_s19  }
  0x32 PF: > { %s232_s25 = sand.u32 1, %s527_s9   ;;  %p345_p3 = pnand %p317_p9, %p614_p6 }
  0x33   : > { %s233_s26 = scalar_lea.sflag [#allocation4], %s232_s25 }
  0x34   : > { %p346_p7 = pneg %p345_p3 }
  0x36   : > { %522 = dma.done.wait (%p346_p7), %s233_s26, 32  }
  0x37   : > { %524 = vsyncadd (%p346_p7), %s233_s26, 4294967264  ;;  %s19_s14 = sadd.s32 1, %s547_s14   ;;  %s724_s9 = smov %s531_s10 }
  0x38   : > { %p16_p10 = scmp.ge.s32.totalorder %s19_s14, 4   ;;  %s725_s10 = smov %s535_s11 }
  0x39   : > { %s726_s11 = smov %s653_s6  ;;  %s727_s12 = smov %s543_s13 }
  0x3a   : > { %s728_s13 = smov %s730_s27  ;;  %18 = sbr.rel (!%p16_p10) target bundleno = 7 (0x7), region = 78 }
  0x3f   :  { %239 = vsyncpa [#allocation3], 1 }
  0x40   :  { %241 = vsyncpa [#allocation3 + $0x1], 1 }
  0x41   :  { %242 = vsyncpa [#allocation6], 1 }
  0x42   :  { %243 = vsyncpa [#allocation4], 1 }
  0x43   :  { %245 = vsyncpa [#allocation4 + $0x1], 1 }

</bundles_post_ra>
